<compile_context>
chip_gen: v7x
topology: tpu7x:2x2x1
jax: 0.10.0
libtpu: 0.0.40
codegen_flags: <defaults>
</compile_context>

<pallas_src>
from functools import partial

import jax
import jax.numpy as jnp
from jax.experimental import pallas as pl
from jax.experimental.pallas import tpu as pltpu

ALPHA = 0.667
GAMMA = 7.9

_LANES = 128
_SUBLANES = 8
# 4096x128 f32 block = 2 MiB; 2 inputs x 2 pipeline buffers = 8 MiB VMEM,
# within the default scoped VMEM limit on v5e (16 MiB) / v6e / v7x (32 MiB).
_MAX_BLOCK_ROWS = 4096


def _round_up(x, m):
    return ((x + m - 1) // m) * m


def _focal_sum_kernel(p_ref, t_ref, out_ref, *, rows, block_rows, steps,
                      needs_mask, hard_targets):
    c = pl.program_id(0)   # TensorCore split ("parallel")
    i = pl.program_id(1)   # step within split ("arbitrary", accumulates)

    @pl.when(i == 0)
    def _():
        out_ref[...] = jnp.zeros_like(out_ref)

    p = p_ref[...].astype(jnp.float32)
    t = t_ref[...].astype(jnp.float32)

    log_p = jnp.log(p)          # EUP
    log_1mp = jnp.log(1.0 - p)  # EUP

    if hard_targets:
        # Binary-target fast path: pt = p or (1-p) exactly, and log(1-pt)
        # reuses the logs above -> only 3 transcendentals per element.
        t_pos = t >= 0.5
        bce = -jnp.maximum(jnp.where(t_pos, log_p, log_1mp), -100.0)
        log_1m_pt = jnp.where(t_pos, log_1mp, log_p)          # log(1 - pt)
    else:
        # Faithful soft-target path (matches torch binary_cross_entropy).
        clog_p = jnp.maximum(log_p, -100.0)
        clog_1mp = jnp.maximum(log_1mp, -100.0)
        bce = -(t * (clog_p - clog_1mp) + clog_1mp)
        pt = jnp.exp(-bce)                                      # EUP
        log_1m_pt = jnp.log(jnp.maximum(1.0 - pt, 0.0))         # EUP

    # (1 - pt)**gamma as exactly one exp + one log; log(0) -> -inf -> exp -> 0,
    # so pt == 1 (and the 1.0-padding) contributes exactly zero, never NaN.
    focal = jnp.exp(GAMMA * log_1m_pt) * bce                    # EUP (alpha hoisted)

    if needs_mask:
        # Zero rows that lie past the real array (garbage from partial /
        # clamped edge blocks).  `rows` is a trace-time constant.
        row0 = (c * steps + i) * block_rows
        rid = jax.lax.broadcasted_iota(jnp.int32, focal.shape, 0) + row0
        focal = jnp.where(rid < rows, focal, 0.0)

    # VPU-only partial reduction: collapse the block into one (8,128) vreg tile
    # (elementwise adds of sublane tiles, no XLU), accumulated in the resident
    # output block.  Final scalar reduction happens in the wrapper.
    part = focal.reshape(block_rows // _SUBLANES, _SUBLANES, _LANES).sum(axis=0)
    out_ref[...] += part[None]


@partial(jax.jit, static_argnames=("hard_targets",))
def focal_loss(inputs, targets, hard_targets=False):
    """Pallas forward of FocalLoss(alpha=0.667, gamma=7.9). Returns scalar f32.

    hard_targets=True enables the binary-target fast path (3 instead of 5
    transcendentals/element); default False keeps the general soft-target math.
    """
    flat_p = inputs.reshape(-1)     # native dtype; f32 cast happens in-kernel
    flat_t = targets.reshape(-1)
    n = flat_p.shape[0]

    # ---- static tiling arithmetic (Python ints at trace time) -------------
    # Lane alignment only: we need n to fill whole 128-lane rows and at least
    # one (8,128) tile.  Pad value p = t = 1.0 contributes exactly zero focal
    # loss, so the <=1023 padded elements need no mask.  All *block*-level
    # raggedness is handled in-kernel (no big jnp.pad HBM round-trip).
    # TODO(synk): a sub-128 ragged tail still goes through one jnp.pad copy;
    # unavoidable for the (rows, 128) reshape.
    rows = max(pl.cdiv(n, _LANES), _SUBLANES)
    pad = rows * _LANES - n
    if pad:
        flat_p = jnp.pad(flat_p, (0, pad), constant_values=1.0)
        flat_t = jnp.pad(flat_t, (0, pad), constant_values=1.0)

    p2 = flat_p.reshape(rows, _LANES)
    t2 = flat_t.reshape(rows, _LANES)

    # Split across TensorCores (v7x has 2) whenever there are >= 2 sublane
    # tiles; degenerates to a harmless size-1 axis on v5e/v6e.
    n_split = 2 if rows >= 2 * _SUBLANES else 1
    rows_per_split = pl.cdiv(rows, n_split)
    block_rows = min(_round_up(rows_per_split, _SUBLANES),
                     _MAX_BLOCK_ROWS,
                     (rows // _SUBLANES) * _SUBLANES)   # never exceeds the array
    steps = pl.cdiv(rows_per_split, block_rows)
    last_block = pl.cdiv(rows, block_rows) - 1
    needs_mask = (n_split * steps * block_rows) != rows

    # Clamp the block index so no DMA ever starts past the end of the array;
    # logically over-hanging rows are zeroed by the in-kernel mask.
    in_spec = pl.BlockSpec(
        (block_rows, _LANES),
        lambda c, i, s=steps, lb=last_block: (jnp.minimum(c * s + i, lb), 0))
    out_spec = pl.BlockSpec((1, _SUBLANES, _LANES), lambda c, i: (c, 0, 0))

    kernel = partial(_focal_sum_kernel, rows=rows, block_rows=block_rows,
                     steps=steps, needs_mask=needs_mask,
                     hard_targets=hard_targets)

    partials = pl.pallas_call(
        kernel,
        out_shape=jax.ShapeDtypeStruct((n_split, _SUBLANES, _LANES), jnp.float32),
        grid_spec=pltpu.PrefetchScalarGridSpec(
            num_scalar_prefetch=0,
            grid=(n_split, steps),
            in_specs=[in_spec, in_spec],
            out_specs=out_spec,
        ),
        compiler_params=pltpu.CompilerParams(
            dimension_semantics=("parallel", "arbitrary")),
    )(p2, t2)

    # alpha and the mean's 1/N folded into one trace-time Python scalar
    # (exact in double precision even for n > 2^24).
    return (jnp.sum(partials) * (ALPHA / n)).astype(jnp.float32)


def _focal_loss_ref(inputs, targets):
    p = inputs.astype(jnp.float32)
    t = targets.astype(jnp.float32)
    log_p = jnp.maximum(jnp.log(p), -100.0)
    log_1mp = jnp.maximum(jnp.log(1.0 - p), -100.0)
    bce = -(t * log_p + (1.0 - t) * log_1mp)
    pt = jnp.exp(-bce)
    return jnp.mean(ALPHA * jnp.power(1.0 - pt, GAMMA) * bce)


if __name__ == "__main__":
    key = jax.random.PRNGKey(0)
    k1, k2 = jax.random.split(key)

    # NCHW-shaped synthetic example (batch=2, channels=4, spatial=16x16).
    shape = (2, 4, 16, 16)
    inputs = jax.nn.sigmoid(jax.random.normal(k1, shape, jnp.float32))
    targets = (jax.random.uniform(k2, shape) > 0.5).astype(jnp.float32)

    ref = _focal_loss_ref(inputs, targets)

    # Faithful soft-target path (default).
    out_soft = jax.block_until_ready(focal_loss(inputs, targets))
    assert jnp.allclose(out_soft, ref, rtol=3e-5, atol=1e-6), (out_soft, ref)

    # Binary-target fast path (these targets are hard 0/1).
    out_hard = jax.block_until_ready(focal_loss(inputs, targets, hard_targets=True))
    assert jnp.allclose(out_hard, ref, rtol=1e-4, atol=1e-6), (out_hard, ref)

    print("KERNEL_OK")
</pallas_src>

<mosaic_0001>
module attributes {stable_mosaic.version = 11 : i64} {
  func.func @_focal_sum_kernel(%arg0: i32, %arg1: i32, %arg2: memref<8x128xf32, #tpu.memory_space<vmem>>, %arg3: memref<8x128xf32, #tpu.memory_space<vmem>>, %arg4: memref<1x8x128xf32, #tpu.memory_space<vmem>>) attributes {dimension_semantics = [#tpu.dimension_semantics<parallel>, #tpu.dimension_semantics<arbitrary>], iteration_bounds = array<i64: 2, 1>, scalar_prefetch = 0 : i64, scratch_operands = 0 : i64, tpu.core_type = #tpu.core_type<tc>, window_params = [{transform_indices = @transform_0, window_bounds = array<i64: 8, 128>}, {transform_indices = @transform_1, window_bounds = array<i64: 8, 128>}, {transform_indices = @transform_2, window_bounds = array<i64: 1, 8, 128>}]} {
    %c0_i32 = arith.constant 0 : i32
    %0 = arith.cmpi eq, %arg1, %c0_i32 : i32
    %1 = arith.extui %0 : i1 to i32
    %c0_i32_0 = arith.constant 0 : i32
    %2 = arith.cmpi ne, %1, %c0_i32_0 : i32
    scf.if %2 {
      %cst_18 = arith.constant 0.000000e+00 : f32
      %36 = vector.broadcast %cst_18 : f32 to vector<1x8x128xf32>
      %c0_19 = arith.constant 0 : index
      %c0_20 = arith.constant 0 : index
      %c0_21 = arith.constant 0 : index
      %37 = vector.load %arg4[%c0_19, %c0_20, %c0_21] : memref<1x8x128xf32, #tpu.memory_space<vmem>>, vector<1x8x128xf32>
      tpu.vector_store %arg4[%c0_19, %c0_20, %c0_21], %36 {strides = array<i32>} : memref<1x8x128xf32, #tpu.memory_space<vmem>>, vector<1x8x128xf32>,
    } else {
    }
    %c0 = arith.constant 0 : index
    %c0_1 = arith.constant 0 : index
    %3 = vector.load %arg2[%c0, %c0_1] : memref<8x128xf32, #tpu.memory_space<vmem>>, vector<8x128xf32>
    %c0_2 = arith.constant 0 : index
    %c0_3 = arith.constant 0 : index
    %4 = vector.load %arg3[%c0_2, %c0_3] : memref<8x128xf32, #tpu.memory_space<vmem>>, vector<8x128xf32>
    %5 = math.log %3 : vector<8x128xf32>
    %cst = arith.constant 1.000000e+00 : f32
    %6 = vector.broadcast %cst : f32 to vector<8x128xf32>
    %7 = arith.subf %6, %3 : vector<8x128xf32>
    %8 = math.log %7 : vector<8x128xf32>
    %cst_4 = arith.constant -1.000000e+02 : f32
    %9 = vector.broadcast %cst_4 : f32 to vector<8x128xf32>
    %10 = arith.maximumf %5, %9 : vector<8x128xf32>
    %cst_5 = arith.constant -1.000000e+02 : f32
    %11 = vector.broadcast %cst_5 : f32 to vector<8x128xf32>
    %12 = arith.maximumf %8, %11 : vector<8x128xf32>
    %13 = arith.subf %10, %12 : vector<8x128xf32>
    %14 = arith.mulf %4, %13 : vector<8x128xf32>
    %15 = arith.addf %14, %12 : vector<8x128xf32>
    %cst_6 = arith.constant 0.000000e+00 : f32
    %16 = vector.broadcast %cst_6 : f32 to vector<8x128xf32>
    %17 = arith.subf %16, %15 : vector<8x128xf32>
    %cst_7 = arith.constant 0.000000e+00 : f32
    %18 = vector.broadcast %cst_7 : f32 to vector<8x128xf32>
    %19 = arith.subf %18, %17 : vector<8x128xf32>
    %20 = math.exp %19 : vector<8x128xf32>
    %cst_8 = arith.constant 1.000000e+00 : f32
    %21 = vector.broadcast %cst_8 : f32 to vector<8x128xf32>
    %22 = arith.subf %21, %20 : vector<8x128xf32>
    %cst_9 = arith.constant 0.000000e+00 : f32
    %23 = vector.broadcast %cst_9 : f32 to vector<8x128xf32>
    %24 = arith.maximumf %22, %23 : vector<8x128xf32>
    %25 = math.log %24 : vector<8x128xf32>
    %cst_10 = arith.constant 7.900000e+00 : f32
    %26 = vector.broadcast %cst_10 : f32 to vector<8x128xf32>
    %27 = arith.mulf %26, %25 : vector<8x128xf32>
    %28 = math.exp %27 : vector<8x128xf32>
    %29 = arith.mulf %28, %17 : vector<8x128xf32>
    %30 = vector.shape_cast %29 : vector<8x128xf32> to vector<1x8x128xf32>
    %cst_11 = arith.constant dense<0.000000e+00> : vector<8x128xf32>
    %31 = vector.multi_reduction <add>, %30, %cst_11 [0] : vector<1x8x128xf32> to vector<8x128xf32>
    %c0_12 = arith.constant 0 : index
    %c0_13 = arith.constant 0 : index
    %c0_14 = arith.constant 0 : index
    %32 = vector.load %arg4[%c0_12, %c0_13, %c0_14] : memref<1x8x128xf32, #tpu.memory_space<vmem>>, vector<1x8x128xf32>
    %33 = vector.shape_cast %31 : vector<8x128xf32> to vector<1x8x128xf32>
    %34 = arith.addf %32, %33 : vector<1x8x128xf32>
    %c0_15 = arith.constant 0 : index
    %c0_16 = arith.constant 0 : index
    %c0_17 = arith.constant 0 : index
    %35 = vector.load %arg4[%c0_15, %c0_16, %c0_17] : memref<1x8x128xf32, #tpu.memory_space<vmem>>, vector<1x8x128xf32>
    tpu.vector_store %arg4[%c0_15, %c0_16, %c0_17], %34 {strides = array<i32>} : memref<1x8x128xf32, #tpu.memory_space<vmem>>, vector<1x8x128xf32>,
    return
  }
  func.func @transform_0(%arg0: i32, %arg1: i32) -> (i32, i32) {
    %c1_i32 = arith.constant 1 : i32
    %0 = arith.muli %arg0, %c1_i32 : i32
    %1 = arith.addi %0, %arg1 : i32
    %c1_i32_0 = arith.constant 1 : i32
    %2 = arith.minsi %1, %c1_i32_0 : i32
    %c0_i32 = arith.constant 0 : i32
    %c0_i32_1 = arith.constant 0 : i32
    return %2, %c0_i32 : i32, i32
  }
  func.func @transform_1(%arg0: i32, %arg1: i32) -> (i32, i32) {
    %c1_i32 = arith.constant 1 : i32
    %0 = arith.muli %arg0, %c1_i32 : i32
    %1 = arith.addi %0, %arg1 : i32
    %c1_i32_0 = arith.constant 1 : i32
    %2 = arith.minsi %1, %c1_i32_0 : i32
    %c0_i32 = arith.constant 0 : i32
    %c0_i32_1 = arith.constant 0 : i32
    return %2, %c0_i32 : i32, i32
  }
  func.func @transform_2(%arg0: i32, %arg1: i32) -> (i32, i32, i32) {
    %c0_i32 = arith.constant 0 : i32
    %c0_i32_0 = arith.constant 0 : i32
    %c0_i32_1 = arith.constant 0 : i32
    return %arg0, %c0_i32, %c0_i32_0 : i32, i32, i32
  }
}

</mosaic_0001>

<bundles_post_ra>
// kernel: focal_loss.1
= control target key start
LH: loop header
LB: loop body
LE: loop exit
PB: predicated region body
PF: predicated region fallthrough
CT: control target
= control target key end

     0   :  { %s406_s9 = smov 0   ;;  %s408_s10 = smov 0   ;;  %s446_s0 = inlined_call_operand.vmem [shape: f32[16,128], index: 0, kind: input, shape index: {}]   ;;  %s447_s1 = inlined_call_operand.vmem [shape: f32[16,128], index: 1, kind: input, shape index: {}]   ;;  %s448_s2 = inlined_call_operand.vmem [shape: f32[2,8,128], index: 2, kind: output, shape index: {}]  }
   0x1   :  { %s410_s11 = smov 0  }
   0x2 LB: > { %s24_s12 = sadd.s32 1, %s385_s10  ;;  %p320_p0 = scmp.ge.s32.totalorder %s389_s11, 1  ;;  %s389_s11 = sphi %s410_s11, %s12_s11   ;;  %s385_s10 = sphi %s408_s10, %s450_s10   ;;  %s381_s9 = sphi %s406_s9, %s449_s9  }
   0x3   : > { %p26_p1 = scmp.ge.s32.totalorder %s24_s12, 2  ;;  %p156_p2 = scmp.lt.s32.totalorder %s389_s11, 3 }
   0x5   : > { %s452_s12 = smov (%p26_p1, %s24_s12), 0  ;;  %p157_p3 = pnand %p320_p0, %p156_p2 }
   0x6   : > { %p187_p4 = scmp.lt.s32.totalorder (!%p157_p3), %s381_s9, 1 }
   0x7   : > { %160 = sbr.rel (%p157_p3) target bundleno = 95 (0x5f), region = 28 }
   0xe   : > { %s454_s9 = smov (!%p187_p4, %s381_s9), 1 }
   0xf   : > { %s190_s13 = scalar_select %p187_p4, %s454_s9, 1 }
  0x10   : > { %s329_s21 = sshll.u32 %s454_s9, 3 }
  0x11   : > { %s324_s14 = sshll.u32 %s190_s13, 3  ;;  %s209_s24 = scalar_lea.vmem %s448_s2, %s329_s21 }
  0x12   : > { %s192_s17 = scalar_lea.vmem %s446_s0, %s324_s14  ;;  %s202_s20 = scalar_lea.vmem %s447_s1, %s324_s14 }
  0x13   : > { %v215_v0 = vld [vmem:[%s192_s17] sm:$0xff] }
  0x14   : > { %357 = vlog2.f32 %v215_v0  ;;  %v219_v1 = vsub.f32 1.0, %v215_v0  ;;  %v216_v8 = vld [vmem:[%s202_s20] sm:$0xff] }
  0x16   : > { %359 = vlog2.f32 %v219_v1 }
  0x1e   : > { %v358_v2 = vpop.eup %357 }
  0x1f   : > { %v218_v3 = vmul.f32 0.6931472, %v358_v2 }
  0x20   : > { %v360_v4 = vpop.eup %359 }
  0x21   : > { %v221_v5 = vmul.f32 0.6931472, %v360_v4  ;;  %v222_v6 = vmax.f32 %v218_v3, -100.0 }
  0x23   : > { %v223_v7 = vmax.f32 %v221_v5, -100.0 }
  0x25   : > { %v224_v9 = vsub.f32 %v222_v6, %v223_v7 }
  0x27   : > { %v225_v10 = vmul.f32 %v224_v9, %v216_v8 }
  0x29   : > { %v226_v11 = vadd.f32 %v225_v10, %v223_v7 }
  0x2b   : > { %v227_v12 = vsub.f32 0.0, %v226_v11 }
  0x2d   : > { %v228_v13 = vsub.f32 0.0, %v227_v12 }
  0x2f   : > { %v229_v14 = vmul.f32 1.442695, %v228_v13 }
  0x31   : > { %361 = vpow2.f32 %v229_v14 }
  0x3b   : > { %v362_v15 = vpop.eup %361 }
  0x3c   : > { %v231_v16 = vsub.f32 1.0, %v362_v15 }
  0x3e   : > { %v232_v17 = vmax.f32 %v231_v16, 0.0 }
  0x40   : > { %363 = vlog2.f32 %v232_v17 }
  0x4a   : > { %v364_v18 = vpop.eup %363 }
  0x4b   : > { %v234_v19 = vmul.f32 0.6931472, %v364_v18 }
  0x4d   : > { %v235_v20 = vmul.f32 7.9, %v234_v19 }
  0x4f   : > { %v236_v21 = vmul.f32 1.442695, %v235_v20 }
  0x51   : > { %365 = vpow2.f32 %v236_v21 }
  0x5b   : > { %v366_v22 = vpop.eup %365 }
  0x5c   : > { %v238_v23 = vmul.f32 %v366_v22, %v227_v12 }
  0x5e   : > { %242 = vst [vmem:[%s209_s24] sm:$0xff] %v238_v23 }
  0x5f PF: > { %s12_s11 = sadd.s32 1, %s389_s11   ;;  %s449_s9 = smov %s385_s10 }
  0x60   : > { %p9_p5 = scmp.ge.s32.totalorder %s12_s11, 4   ;;  %s450_s10 = smov %s452_s12 }
  0x62   :  { %11 = sbr.rel (!%p9_p5) target bundleno = 2 (0x2), region = 65 }

</bundles_post_ra>
